<compile_context>
chip_gen: v5e
topology: v5e:2x2
jax: 0.10.0
libtpu: 0.0.40
codegen_flags: <defaults>
</compile_context>

<pallas_src>
import jax
import jax.numpy as jnp
import numpy as np
from jax import lax
from jax.experimental import pallas as pl
from jax.experimental.pallas import tpu as pltpu


def _matmul_operand_dtype():
    """bf16 operands (f32 accumulation, MXU-native) on real TPUs; f32 elsewhere."""
    return jnp.bfloat16 if jax.default_backend() == "tpu" else jnp.float32


def _nonlocal_kernel(gw_ref, km_ref, xq_ref, o_ref):
    """One (batch, query-tile) grid step, channels-first.

    gw_ref : (1, C, N)   value-side keys projection  (W_w W_g) X        (matmul dtype)
    km_ref : (1, C, N)   affinity-side keys projection M X, M = W_tc^T W_theta / C
    xq_ref : (1, C, TQ)  raw input stripe (affinity query side + residual, x dtype)
    o_ref  : (1, C, TQ)  output stripe (residual included)
    """
    x_q = xq_ref[0]                                   # (C, TQ), input dtype (residual path)
    gw = gw_ref[0]                                    # (C, N)
    km = km_ref[0]                                    # (C, N)
    mm_dtype = km.dtype

    # Affinity scores with keys on the sublane axis: s[k, q] = km[:, k] . x[:, q].
    # A^T B form (contract dim 0 of both operands) -> MXU transposed-LHS path,
    # no explicit XLU transpose anywhere in the kernel.
    s = lax.dot_general(km, x_q.astype(mm_dtype),
                        (((0,), (0,)), ((), ())),
                        preferred_element_type=jnp.float32)        # (N, TQ)

    # Numerically stable softmax over keys (axis 0).  exp stays f32 (v5e has no
    # bf16 EUP); sublane-direction max/sum are mostly plain VPU vreg ops.
    s_max = jnp.max(s, axis=0, keepdims=True)                      # (1, TQ)
    p = jnp.exp(s - s_max)                                         # (N, TQ), f32
    denom = jnp.sum(p, axis=0, keepdims=True)                      # (1, TQ), >= 1

    # Value matmul (final 1x1 conv already folded into gw) on the UNNORMALIZED
    # probabilities, then normalize the small (C, TQ) result instead of scaling
    # the (N, TQ) slab.  denom is only (1, TQ), so an exact divide is negligible.
    wy = jnp.dot(gw, p.astype(mm_dtype),
                 preferred_element_type=jnp.float32)               # (C, TQ)
    wy = wy * (1.0 / denom)                                        # broadcast over rows

    o_ref[0] = (wy + x_q.astype(jnp.float32)).astype(o_ref.dtype)


def _pick_query_tile(n, c, batch, operand_itemsize, budget_bytes=40 * 1024 * 1024):
    """Largest lane-aligned query tile whose per-step VMEM footprint fits the budget.

    Accounts for the resident keys-side projections (2 x (C, N) in the matmul
    operand dtype, double-buffered by the pipeline), the double-buffered f32
    query/output stripes, and the f32 (N, TQ) score + exp slabs (dominant term).
    """
    if n % 128 != 0:
        return n                                      # awkward N -> single full-width stripe
    resident = 2 * 2 * c * n * operand_itemsize       # gw + km, double-buffered
    tq = 128
    for cand in (2048, 1024, 512, 256, 128):
        per_step = 8 * n * cand + 20 * c * cand       # f32 scores + exp, x/out stripes, wy
        if n % cand == 0 and resident + per_step <= budget_bytes:
            tq = cand
            break
    # v7x has two TensorCores: keep at least two grid steps so both get work.
    while batch * (n // tq) < 2 and tq % 256 == 0:
        tq //= 2
    return tq


def nonlocal_block_2d(x_nchw, w_g, w_theta, w_w, *, tq=None):
    """NONLocalBlock2D forward.  x_nchw: (B, C, H, W); weights: (C, C) (out_ch, in_ch)."""
    B, C, H, W = x_nchw.shape
    N = H * W
    x_cf = x_nchw.reshape(B, C, N)                    # channels-first flattened (free reshape)

    f32 = jnp.float32
    mm_dtype = _matmul_operand_dtype()

    # ---- Exact host-side weight folds (tiny (C, C) f32 math) ----
    w_g32 = w_g.astype(f32)
    w_th32 = w_theta.astype(f32)
    w_w32 = w_w.astype(f32)
    w_gw = jnp.dot(w_w32, w_g32)                                        # W_w @ W_g
    w_tc = w_th32 - jnp.mean(w_th32, axis=0, keepdims=True)             # centered theta weight
    m_aff = jnp.dot(w_tc.T, w_th32) / C                                 # W_tc^T W_theta / C

    # ---- Keys-side projections: one small-K matmul per batch, pre-cast ----
    w_keys = jnp.concatenate([w_gw, m_aff], axis=0)                     # (2C, C)
    proj = jnp.einsum('oc,bcn->bon', w_keys, x_cf.astype(f32)).astype(mm_dtype)  # (B, 2C, N)
    gw_full = proj[:, :C, :]                                            # (B, C, N)
    km_full = proj[:, C:, :]                                            # (B, C, N)

    operand_itemsize = 2 if mm_dtype == jnp.bfloat16 else 4
    if tq is None:
        tq = _pick_query_tile(N, C, B, operand_itemsize)
    if tq != N and (N % tq != 0 or tq % 128 != 0):
        tq = N
    num_q = N // tq

    out_cf = pl.pallas_call(
        _nonlocal_kernel,
        out_shape=jax.ShapeDtypeStruct((B, C, N), x_nchw.dtype),
        grid_spec=pltpu.PrefetchScalarGridSpec(
            num_scalar_prefetch=0,
            grid=(B, num_q),
            in_specs=[
                # Keys-side projections: block index constant along q, so the
                # pipeline keeps them resident per batch element (no re-fetch).
                pl.BlockSpec((1, C, N), lambda b, q: (b, 0, 0)),
                pl.BlockSpec((1, C, N), lambda b, q: (b, 0, 0)),
                # Raw-input query stripe (affinity query side + residual).
                pl.BlockSpec((1, C, tq), lambda b, q: (b, 0, q)),
            ],
            out_specs=pl.BlockSpec((1, C, tq), lambda b, q: (b, 0, q)),
        ),
        compiler_params=pltpu.CompilerParams(
            dimension_semantics=("parallel", "parallel"),
            # Below v7x's 64 MiB physical VMEM (headroom for Mosaic scratch);
            # v5e/v6e (128 MiB) could go higher for even larger tiles.
            vmem_limit_bytes=48 * 1024 * 1024,
        ),
    )(gw_full, km_full, x_cf)

    return out_cf.reshape(B, C, H, W)


def _reference(x_nchw, w_g, w_theta, w_w):
    """Pure-JAX reference mirroring the PyTorch forward exactly (no folds)."""
    B, C, H, W = x_nchw.shape
    N = H * W
    x = x_nchw.astype(jnp.float32)

    def conv1x1(inp, w):  # inp (B,C,H,W), w (Cout,Cin)
        return jnp.einsum('bchw,oc->bohw', inp, w)

    g_x = conv1x1(x, w_g).reshape(B, C, N).transpose(0, 2, 1)          # (B, N, C)
    theta_x = conv1x1(x, w_theta).reshape(B, C, N).transpose(0, 2, 1)  # (B, N, C)
    mean = theta_x.mean(axis=2, keepdims=True)                         # per-location channel mean
    f = jnp.einsum('bnc,bmc->bnm', theta_x - mean, theta_x) / C
    f_div_C = jax.nn.softmax(f, axis=-1)
    y = jnp.einsum('bnm,bmc->bnc', f_div_C, g_x)                       # (B, N, C)
    y = y.transpose(0, 2, 1).reshape(B, C, H, W)
    w_y = conv1x1(y, w_w)
    return w_y + x


if __name__ == "__main__":
    B, C, H, W = 2, 8, 16, 16

    key = jax.random.PRNGKey(0)
    kx, kg, kt, kw = jax.random.split(key, 4)

    x = jax.random.normal(kx, (B, C, H, W), dtype=jnp.float32)

    # Conv2d(C, C, kernel_size=1, bias=False)-shaped weights, uniform(-1/sqrt(C), 1/sqrt(C)).
    bound = 1.0 / np.sqrt(C)
    w_g = jax.random.uniform(kg, (C, C), jnp.float32, -bound, bound)
    w_theta = jax.random.uniform(kt, (C, C), jnp.float32, -bound, bound)
    w_w_zero = jnp.zeros((C, C), jnp.float32)    # module init: nn.init.constant_(W.weight, 0)
    w_w_rand = jax.random.uniform(kw, (C, C), jnp.float32, -bound, bound)

    # (1) Faithful-to-init case: W == 0  ->  output must equal the input exactly.
    out0 = jax.block_until_ready(nonlocal_block_2d(x, w_g, w_theta, w_w_zero))
    assert out0.shape == (B, C, H, W)
    np.testing.assert_allclose(np.asarray(out0), np.asarray(x), rtol=1e-6, atol=1e-6)

    # (2) Full non-local path with a nonzero W; run the default tiling and a forced
    #     128-wide query tiling (two query tiles per batch element).
    ref = jax.block_until_ready(_reference(x, w_g, w_theta, w_w_rand))
    tol = 3e-2 if jax.default_backend() == "tpu" else 2e-3   # bf16 operands vs pure f32
    for tq in (None, 128):
        out = jax.block_until_ready(nonlocal_block_2d(x, w_g, w_theta, w_w_rand, tq=tq))
        assert out.shape == (B, C, H, W)
        np.testing.assert_allclose(np.asarray(out), np.asarray(ref), rtol=tol, atol=tol)

    print("KERNEL_OK")
</pallas_src>

<mosaic_0001>
module attributes {stable_mosaic.version = 11 : i64} {
  func.func @_nonlocal_kernel(%arg0: i32, %arg1: i32, %arg2: memref<1x8x256xf32, #tpu.memory_space<vmem>>, %arg3: memref<1x8x256xf32, #tpu.memory_space<vmem>>, %arg4: memref<1x8x256xf32, #tpu.memory_space<vmem>>, %arg5: memref<1x8x256xf32, #tpu.memory_space<vmem>>) attributes {dimension_semantics = [#tpu.dimension_semantics<parallel>, #tpu.dimension_semantics<parallel>], iteration_bounds = array<i64: 2, 1>, scalar_prefetch = 0 : i64, scratch_operands = 0 : i64, tpu.core_type = #tpu.core_type<tc>, window_params = [{transform_indices = @transform_0, window_bounds = array<i64: 1, 8, 256>}, {transform_indices = @transform_1, window_bounds = array<i64: 1, 8, 256>}, {transform_indices = @transform_2, window_bounds = array<i64: 1, 8, 256>}, {transform_indices = @transform_3, window_bounds = array<i64: 1, 8, 256>}]} {
    %c0 = arith.constant 0 : index
    %c0_0 = arith.constant 0 : index
    %c0_1 = arith.constant 0 : index
    %0 = vector.load %arg4[%c0, %c0_0, %c0_1] : memref<1x8x256xf32, #tpu.memory_space<vmem>>, vector<1x8x256xf32>
    %1 = vector.shape_cast %0 : vector<1x8x256xf32> to vector<8x256xf32>
    %c0_2 = arith.constant 0 : index
    %c0_3 = arith.constant 0 : index
    %c0_4 = arith.constant 0 : index
    %2 = vector.load %arg2[%c0_2, %c0_3, %c0_4] : memref<1x8x256xf32, #tpu.memory_space<vmem>>, vector<1x8x256xf32>
    %3 = vector.shape_cast %2 : vector<1x8x256xf32> to vector<8x256xf32>
    %c0_5 = arith.constant 0 : index
    %c0_6 = arith.constant 0 : index
    %c0_7 = arith.constant 0 : index
    %4 = vector.load %arg3[%c0_5, %c0_6, %c0_7] : memref<1x8x256xf32, #tpu.memory_space<vmem>>, vector<1x8x256xf32>
    %5 = vector.shape_cast %4 : vector<1x8x256xf32> to vector<8x256xf32>
    %cst = arith.constant dense<0.000000e+00> : vector<256x256xf32>
    %6 = tpu.matmul %5, %1, %cst {dimension_numbers = #tpu.dot_dimension_numbers<[0], [0], [1], [1], [0, 1, 1, 1], [], []>} : vector<8x256xf32>, vector<8x256xf32>, vector<256x256xf32> -> vector<256x256xf32>
    %cst_8 = arith.constant dense<0xFF800000> : vector<256xf32>
    %7 = vector.multi_reduction <maximumf>, %6, %cst_8 [0] : vector<256x256xf32> to vector<256xf32>
    %8 = vector.shape_cast %7 : vector<256xf32> to vector<1x256xf32>
    %9 = vector.broadcast %8 : vector<1x256xf32> to vector<256x256xf32>
    %10 = arith.subf %6, %9 : vector<256x256xf32>
    %11 = math.exp %10 : vector<256x256xf32>
    %cst_9 = arith.constant dense<0.000000e+00> : vector<256xf32>
    %12 = vector.multi_reduction <add>, %11, %cst_9 [0] : vector<256x256xf32> to vector<256xf32>
    %13 = vector.shape_cast %12 : vector<256xf32> to vector<1x256xf32>
    %cst_10 = arith.constant dense<0.000000e+00> : vector<8x256xf32>
    %14 = tpu.matmul %3, %11, %cst_10 {dimension_numbers = #tpu.dot_dimension_numbers<[1], [0], [0], [1], [0, 0, 1, 1], [], []>} : vector<8x256xf32>, vector<256x256xf32>, vector<8x256xf32> -> vector<8x256xf32>
    %cst_11 = arith.constant 1.000000e+00 : f32
    %15 = vector.broadcast %cst_11 : f32 to vector<1x256xf32>
    %16 = arith.divf %15, %13 : vector<1x256xf32>
    %17 = vector.broadcast %16 : vector<1x256xf32> to vector<8x256xf32>
    %18 = arith.mulf %14, %17 : vector<8x256xf32>
    %19 = arith.addf %18, %1 : vector<8x256xf32>
    %c0_12 = arith.constant 0 : index
    %c0_13 = arith.constant 0 : index
    %c0_14 = arith.constant 0 : index
    %20 = vector.load %arg5[%c0_12, %c0_13, %c0_14] : memref<1x8x256xf32, #tpu.memory_space<vmem>>, vector<1x8x256xf32>
    %21 = vector.shape_cast %20 : vector<1x8x256xf32> to vector<8x256xf32>
    %22 = vector.shape_cast %19 : vector<8x256xf32> to vector<1x8x256xf32>
    tpu.vector_store %arg5[%c0_12, %c0_13, %c0_14], %22 {strides = array<i32>} : memref<1x8x256xf32, #tpu.memory_space<vmem>>, vector<1x8x256xf32>,
    return
  }
  func.func @transform_0(%arg0: i32, %arg1: i32) -> (i32, i32, i32) {
    %c0_i32 = arith.constant 0 : i32
    %c0_i32_0 = arith.constant 0 : i32
    %c0_i32_1 = arith.constant 0 : i32
    return %arg0, %c0_i32, %c0_i32_0 : i32, i32, i32
  }
  func.func @transform_1(%arg0: i32, %arg1: i32) -> (i32, i32, i32) {
    %c0_i32 = arith.constant 0 : i32
    %c0_i32_0 = arith.constant 0 : i32
    %c0_i32_1 = arith.constant 0 : i32
    return %arg0, %c0_i32, %c0_i32_0 : i32, i32, i32
  }
  func.func @transform_2(%arg0: i32, %arg1: i32) -> (i32, i32, i32) {
    %c0_i32 = arith.constant 0 : i32
    %c0_i32_0 = arith.constant 0 : i32
    return %arg0, %c0_i32, %arg1 : i32, i32, i32
  }
  func.func @transform_3(%arg0: i32, %arg1: i32) -> (i32, i32, i32) {
    %c0_i32 = arith.constant 0 : i32
    %c0_i32_0 = arith.constant 0 : i32
    return %arg0, %c0_i32, %arg1 : i32, i32, i32
  }
}

</mosaic_0001>

<bundles_post_ra>
// kernel: tpu_custom_call.1
= control target key start
LH: loop header
LB: loop body
LE: loop exit
PB: predicated region body
PF: predicated region fallthrough
CT: control target
= control target key end

     0   :  { %s2491_s0 = inlined_call_operand.hbm [shape: f32[2,8,256], index: 0, kind: input, shape index: {}]   ;;  %s2492_s1 = inlined_call_operand.hbm [shape: f32[2,8,256], index: 1, kind: input, shape index: {}]   ;;  %s2493_s2 = inlined_call_operand.hbm [shape: f32[2,8,256], index: 2, kind: input, shape index: {}]   ;;  %s2494_s3 = inlined_call_operand.hbm [shape: f32[2,8,256], index: 3, kind: output, shape index: {}]  }
   0x1   :  { %2513 = sst [smem:[#allocation31_spill]] %s2492_s1 }
   0x2   :  { %8 = vsyncpa [#allocation3], 0 }
   0x3   :  { %10 = vsyncpa [#allocation3 + $0x1], 0 }
   0x4   :  { %11 = vsyncpa [#allocation6], 0 }
   0x5   :  { %13 = vsyncpa [#allocation6 + $0x1], 0 }
   0x6   :  { %14 = vsyncpa [#allocation4], 0 }
   0x7   :  { %16 = vsyncpa [#allocation4 + $0x1], 0  ;;  %s1779_s12 = smov 0   ;;  %s1781_s13 = smov 0  }
   0x8   :  { %s1783_s14 = smov 0   ;;  %s1785_s15 = smov 0  }
   0x9   :  { %s1787_s16 = smov 0   ;;  %s1789_s17 = smov 0  }
   0xa LB: > { %2514 = sst [smem:[#allocation12_spill]] %s1753_s16  ;;  %s1810_s18 = sadd.s32 4294967295, %s1757_s17   ;;  %s1757_s17 = sphi %s1789_s17, %s22_s17   ;;  %s1753_s16 = sphi %s1787_s16, %s2558_s16   ;;  %s1749_s15 = sphi %s1785_s15, %s2557_s15   ;;  %s1745_s14 = sphi %s1783_s14, %s2561_s14   ;;  %s1741_s13 = sphi %s1781_s13, %s2560_s13   ;;  %s1737_s12 = sphi %s1779_s12, %s2559_s12  }
   0xb   : > { %s1282_s19 = sadd.s32 4294967294, %s1757_s17   ;;  %s34_s20 = sadd.s32 1, %s1753_s16 }
   0xc   : > { %s41_s21 = sadd.s32 1, %s1745_s14  ;;  %p36_p0 = scmp.ge.s32.totalorder %s34_s20, 2 }
   0xd   : > { %p48_p1 = scmp.ne.s32.totalorder %s1745_s14, %s1741_s13  ;;  %p49_p2 = scmp.eq.s32.totalorder %s1757_s17, 0 }
   0xe   : > { %p54_p3 = scmp.ne.s32.totalorder %s1741_s13, %s1737_s12  ;;  %s2563_s20 = smov (%p36_p0, %s34_s20), 0 }
   0xf   : > { %2515 = sst [smem:[#allocation13_spill]] %s2563_s20  ;;  %p1822_p4 = por %p49_p2, %p48_p1 }
  0x10   : > { %p55_p5 = scmp.eq.s32.totalorder %s1810_s18, 0  ;;  %s38_s23 = ssub.s32 %s1753_s16, %s2563_s20 }
  0x11   : > { %p134_p6 = scmp.eq.s32.totalorder %s1810_s18, 1  ;;  %p39_p7 = scmp.eq.s32.totalorder %s38_s23, 0 }
  0x12   : > { %p1830_p8 = por %p55_p5, %p54_p3  ;;  %p140_p10 = scmp.eq.s32.totalorder %s1282_s19, 1 }
  0x13   : > { %p1834_p9 = por %p134_p6, %p48_p1  ;;  %p1284_p12 = scmp.ge.s32.totalorder %s1757_s17, 2 }
  0x14   : > { %s1839_s26 = scalar_select %p39_p7, %s1745_s14, %s41_s21  }
  0x15   : > { %p1841_p11 = por %p140_p10, %p54_p3  ;;  %p1396_p13 = scmp.lt.s32.totalorder %s1757_s17, 2 }
  0x16   : > { %2519 = sst [smem:[#allocation14_spill]] %s1839_s26  ;;  %s160_s28 = sand.u32 1, %s1745_s14  }
  0x17   : > { %s1285_s29 = sshll.u32 %s160_s28, 4  ;;  %s1368_s30 = sshll.u32 %s1753_s16, 4 }
  0x18   : > { %p1851_p0 = pnand %p1396_p13, %p1822_p4  ;;  %s180_s5 = sand.u32 1, %s1757_s17  }
  0x19   : > { %s2522_s1 = sld [smem:[#allocation31_spill]]  ;;  %s184_s10 = scalar_lea.vmem [#allocation5], %s1285_s29 }
  0x1a   : > { %s193_s11 = sshll.u32 %s184_s10, 4  ;;  %s181_s19 = scalar_lea.sflag [#allocation6], %s180_s5  ;;  %s194_s11 = int_to_ptr.vmem [resolvable:$true] %s193_s11 }
  0x1b   : > { %p1294_p1 = scmp.ge.s32.totalorder %s1757_s17, 1  ;;  %p220_p2 = scmp.lt.s32.totalorder %s1757_s17, 3 }
  0x1c   : > { %s169_s6 = scalar_lea.hbm %s2491_s0, %s1368_s30  ;;  %s161_s10 = scalar_lea.sflag [#allocation3], %s160_s28 }
  0x1d   : > { %p1863_p3 = pnand %p1294_p1, %p220_p2  ;;  %s171_s7 = sshll.u32 %s169_s6, 4  ;;  %s172_s7 = int_to_ptr.hbm [resolvable:$true] %s171_s7 }
  0x1e   : > { %s204_s16 = scalar_lea.vmem [#allocation7], %s1285_s29 }
  0x1f   : > { %s189_s8 = scalar_lea.hbm %s2522_s1, %s1368_s30  ;;  %s215_s26 = sshll.u32 %s204_s16, 4  ;;  %s216_s26 = int_to_ptr.vmem [resolvable:$true] %s215_s26 }
  0x20   : > { %s191_s9 = sshll.u32 %s189_s8, 4  ;;  %s164_s8 = scalar_lea.vmem [#allocation2], %s1285_s29  ;;  %s192_s9 = int_to_ptr.hbm [resolvable:$true] %s191_s9 }
  0x21   : > { %1388 = dma.hbm_to_vmem [thread:$0]  (!%p1851_p0), %s192_s9, 256, %s194_s11, %s181_s19  }
  0x22   : > { %s173_s1 = sshll.u32 %s164_s8, 4  ;;  %s211_s11 = scalar_lea.hbm %s2493_s2, %s1368_s30  ;;  %s174_s1 = int_to_ptr.vmem [resolvable:$true] %s173_s1 }
  0x23   : > { %1385 = dma.hbm_to_vmem [thread:$0]  (!%p1851_p0), %s172_s7, 256, %s174_s1, %s161_s10  }
  0x24   : > { %s213_s20 = sshll.u32 %s211_s11, 4  ;;  %224 = sbr.rel (%p1863_p3) target bundleno = 853 (0x355), region = 32  ;;  %s214_s20 = int_to_ptr.hbm [resolvable:$true] %s213_s20 }
  0x25   : > { %1391 = dma.hbm_to_vmem [thread:$0]  (!%p1851_p0), %s214_s20, 256, %s216_s26, %s181_s19  }
  0x29   : > { %s1880_s22 = sand.u32 1, %s1741_s13  }
  0x2a   : > { %s1883_s1 = sshll.u32 %s1880_s22, 4  ;;  %s227_s28 = scalar_lea.sflag [#allocation3], %s1880_s22 }
  0x2b   : > { %s230_s30 = scalar_lea.vmem [#allocation2], %s1883_s1 }
  0x2c   : > { %1724 = dma.done.wait (%p1830_p8), %s227_s28, 256  }
  0x2d   : > { %1726 = vsyncadd (%p1830_p8), %s227_s28, 4294967040  ;;  %s236_s16 = sand.u32 1, %s1810_s18   ;;  %s240_s26 = scalar_lea.vmem [#allocation5], %s1883_s1 }
  0x2e   : > { %s237_s20 = scalar_lea.sflag [#allocation6], %s236_s16 }
  0x2f   : > { %1728 = dma.done.wait (%p1830_p8), %s237_s20, 512  }
  0x30   : > { %1730 = vsyncadd (%p1830_p8), %s237_s20, 4294966784  ;;  %v290_v0 = vld [vmem:[%s240_s26] sm:$0xff]  ;;  %v291_v1 = vld [vmem:[%s240_s26 + $0x8] sm:$0xff]  ;;  %s1898_s29 = scalar_lea.vmem [#allocation7], %s1883_s1  ;;  %vm356_vm0 = vcmask 64512   ;;  %s283_s18 = scalar_lea.vmem [#allocation8], %s1883_s1 }
  0x31   : > { %292 = vxpose.xlu0.b32.start.end [1/1] (short) %v290_v0, 128  ;;  %v286_v2 = vld [vmem:[%s1898_s29] sm:$0xff]  ;;  %v287_v3 = vld [vmem:[%s1898_s29 + $0x8] sm:$0xff]  ;;  %s1371_s24 = sshll.u32 %s1749_s15, 4  ;;  %s1151_s23 = sshll.u32 %s283_s18, 4  ;;  %s1152_s23 = int_to_ptr.vmem [resolvable:$true] %s1151_s23 }
  0x32   : > { %468 = vmatpush.msra.mxu0 %v286_v2  ;;  %581 = vmatpush.msra.mxu1 %v287_v3  ;;  %s1149_s21 = scalar_lea.hbm %s2494_s3, %s1371_s24  ;;  %s1136_s15 = scalar_lea.sflag [#allocation4], %s1880_s22 }
  0x33   : > { %1373 = vmatpush.msra.mxu3 %v287_v3  ;;  %1372 = vmatpush.msra.mxu2 %v286_v2  ;;  %s1153_s6 = sshll.u32 %s1149_s21, 4  ;;  %s1691_s9 = scalar_lea.hbm %s2494_s3, 32  ;;  %s1154_s6 = int_to_ptr.hbm [resolvable:$true] %s1153_s6 }
  0x34   : > { %s1685_s7 = sshra.s32 %s1154_s6, 4  ;;  %s1686_s7 = int_to_ptr.hbm [resolvable:$true] %s1685_s7 }
  0x35   : > { %s1687_s8 = scalar_lea.hbm %s1686_s7, 16  ;;  %p1692_p7 = scmp.lt.s32.totalorder %s1686_s7, %s2494_s3 }
  0x36   : > { %p1688_p4 = scmp.ne.s32.totalorder %s1686_s7, %s1687_s8  ;;  %p1693_p8 = scmp.lt.s32.totalorder %s1691_s9, %s1687_s8 }
  0x38   : > { %p1689_p5 = pnand %p1688_p4, %p1834_p9  ;;  %p1694_p10 = por %p1693_p8, %p1692_p7 }
  0x3a   : > { %p1690_p6 = pneg %p1689_p5 }
  0x3c   : > { %p1695_p13 = pnand %p1694_p10, %p1690_p6 }
  0xb1   : > { %324 = vxpose.xlu0.b32.start.end [1/1] (short) %v291_v1, 128 }
  0xd5   : > { %v308_v4 = vpop.trf.xlu0 }
  0xd6   : > { %1299 = vmatmul.msk.f32.vlgmr.msra.gmra.mxu0 %vm356_vm0, %v308_v4  ;;  %1331 = vmatmul.msk.f32.vlgmr.msra.gmra.mxu1 %vm356_vm0, %v308_v4 }
  0xdd   : > { %v309_v5 = vpop.trf.xlu0 }
  0xde   : > { %1300 = vmatmul.msk.f32.gmra.mxu0 %vm356_vm0, %v309_v5  ;;  %1332 = vmatmul.msk.f32.gmra.mxu1 %vm356_vm0, %v309_v5 }
  0xe5   : > { %v310_v6 = vpop.trf.xlu0 }
  0xe6   : > { %1301 = vmatmul.msk.f32.gmra.mxu0 %vm356_vm0, %v310_v6  ;;  %1333 = vmatmul.msk.f32.gmra.mxu1 %vm356_vm0, %v310_v6 }
  0xed   : > { %v311_v7 = vpop.trf.xlu0 }
  0xee   : > { %1302 = vmatmul.msk.f32.gmra.mxu0 %vm356_vm0, %v311_v7  ;;  %1334 = vmatmul.msk.f32.gmra.mxu1 %vm356_vm0, %v311_v7 }
  0xf5   : > { %v312_v8 = vpop.trf.xlu0 }
  0xf6   : > { %1303 = vmatmul.msk.f32.gmra.mxu0 %vm356_vm0, %v312_v8  ;;  %1335 = vmatmul.msk.f32.gmra.mxu1 %vm356_vm0, %v312_v8 }
  0xfd   : > { %v313_v9 = vpop.trf.xlu0 }
  0xfe   : > { %1304 = vmatmul.msk.f32.gmra.mxu0 %vm356_vm0, %v313_v9  ;;  %1336 = vmatmul.msk.f32.gmra.mxu1 %vm356_vm0, %v313_v9 }
 0x105   : > { %v314_v10 = vpop.trf.xlu0 }
 0x106   : > { %1305 = vmatmul.msk.f32.gmra.mxu0 %vm356_vm0, %v314_v10  ;;  %1337 = vmatmul.msk.f32.gmra.mxu1 %vm356_vm0, %v314_v10 }
 0x10d   : > { %v315_v11 = vpop.trf.xlu0 }
 0x10e   : > { %1306 = vmatmul.msk.f32.gmra.mxu0 %vm356_vm0, %v315_v11  ;;  %1338 = vmatmul.msk.f32.gmra.mxu1 %vm356_vm0, %v315_v11 }
 0x115   : > { %v316_v12 = vpop.trf.xlu0 }
 0x116   : > { %1307 = vmatmul.msk.f32.gmra.mxu0 %vm356_vm0, %v316_v12  ;;  %1339 = vmatmul.msk.f32.gmra.mxu1 %vm356_vm0, %v316_v12 }
 0x11d   : > { %v317_v13 = vpop.trf.xlu0 }
 0x11e   : > { %1308 = vmatmul.msk.f32.gmra.mxu0 %vm356_vm0, %v317_v13  ;;  %1340 = vmatmul.msk.f32.gmra.mxu1 %vm356_vm0, %v317_v13 }
 0x125   : > { %v318_v14 = vpop.trf.xlu0 }
 0x126   : > { %1309 = vmatmul.msk.f32.gmra.mxu0 %vm356_vm0, %v318_v14  ;;  %1341 = vmatmul.msk.f32.gmra.mxu1 %vm356_vm0, %v318_v14 }
 0x12d   : > { %v319_v15 = vpop.trf.xlu0 }
 0x12e   : > { %1310 = vmatmul.msk.f32.gmra.mxu0 %vm356_vm0, %v319_v15  ;;  %1342 = vmatmul.msk.f32.gmra.mxu1 %vm356_vm0, %v319_v15 }
 0x135   : > { %v320_v16 = vpop.trf.xlu0 }
 0x136   : > { %1311 = vmatmul.msk.f32.gmra.mxu0 %vm356_vm0, %v320_v16  ;;  %1343 = vmatmul.msk.f32.gmra.mxu1 %vm356_vm0, %v320_v16 }
 0x13d   : > { %v321_v17 = vpop.trf.xlu0 }
 0x13e   : > { %1312 = vmatmul.msk.f32.gmra.mxu0 %vm356_vm0, %v321_v17  ;;  %1344 = vmatmul.msk.f32.gmra.mxu1 %vm356_vm0, %v321_v17 }
 0x145   : > { %v322_v18 = vpop.trf.xlu0 }
 0x146   : > { %1313 = vmatmul.msk.f32.gmra.mxu0 %vm356_vm0, %v322_v18  ;;  %1345 = vmatmul.msk.f32.gmra.mxu1 %vm356_vm0, %v322_v18 }
 0x14d   : > { %v323_v19 = vpop.trf.xlu0 }
 0x14e   : > { %1314 = vmatmul.msk.f32.gmra.mxu0 %vm356_vm0, %v323_v19  ;;  %1346 = vmatmul.msk.f32.gmra.mxu1 %vm356_vm0, %v323_v19 }
 0x153   : > { %v1946_v26 = vpop.f32.mrf.mxu0  ;;  %v1960_v33 = vpop.f32.mrf.mxu1 }
 0x155   : > { %v340_v20 = vpop.trf.xlu0 }
 0x156   : > { %1315 = vmatmul.msk.f32.gmra.mxu0 %vm356_vm0, %v340_v20  ;;  %1347 = vmatmul.msk.f32.gmra.mxu1 %vm356_vm0, %v340_v20 }
 0x15b   : > { %v1950_v29 = vpop.f32.mrf.mxu0  ;;  %v1966_v36 = vpop.f32.mrf.mxu1 }
 0x15c   : > { %2524 = vst [vmem:[#allocation15_spill] sm:$0xff] %v1966_v36 }
 0x15d   : > { %v341_v21 = vpop.trf.xlu0 }
 0x15e   : > { %1316 = vmatmul.msk.f32.gmra.mxu0 %vm356_vm0, %v341_v21  ;;  %1348 = vmatmul.msk.f32.gmra.mxu1 %vm356_vm0, %v341_v21 }
 0x163   : > { %v1956_v31 = vpop.f32.mrf.mxu0  ;;  %v1972_v40 = vpop.f32.mrf.mxu1 }
 0x164   : > { %2525 = vst [vmem:[#allocation16_spill] sm:$0xff] %v1972_v40  ;;  %v679_v21 = vmax.f32 %v1946_v26, %v1956_v31 }
 0x165   : > { %v342_v22 = vpop.trf.xlu0 }
 0x166   : > { %1317 = vmatmul.msk.f32.gmra.mxu0 %vm356_vm0, %v342_v22  ;;  %1349 = vmatmul.msk.f32.gmra.mxu1 %vm356_vm0, %v342_v22 }
 0x16b   : > { %v1962_v34 = vpop.f32.mrf.mxu0  ;;  %v1980_v43 = vpop.f32.mrf.mxu1 }
 0x16c   : > { %2527 = vst [vmem:[#allocation18_spill] sm:$0xff] %v1980_v43  ;;  %v680_v22 = vmax.f32 %v1950_v29, %v1962_v34 }
 0x16d   : > { %v343_v23 = vpop.trf.xlu0 }
 0x16e   : > { %1318 = vmatmul.msk.f32.gmra.mxu0 %vm356_vm0, %v343_v23  ;;  %1350 = vmatmul.msk.f32.vlgmr.msra.gmra.mxu3 %vm356_vm0, %v343_v23 }
 0x173   : > { %v1968_v37 = vpop.f32.mrf.mxu0  ;;  %v1986_v46 = vpop.f32.mrf.mxu1 }
 0x174   : > { %v681_v23 = vmax.f32 %v679_v21, %v1968_v37 }
 0x175   : > { %v344_v24 = vpop.trf.xlu0 }
 0x176   : > { %1319 = vmatmul.msk.f32.vlgmr.msra.gmra.mxu2 %vm356_vm0, %v344_v24  ;;  %1351 = vmatmul.msk.f32.gmra.mxu3 %vm356_vm0, %v344_v24 }
 0x17b   : > { %v1974_v41 = vpop.f32.mrf.mxu0  ;;  %v1992_v49 = vpop.f32.mrf.mxu1 }
 0x17c   : > { %2526 = vst [vmem:[#allocation17_spill] sm:$0xff] %v1974_v41  ;;  %v682_v24 = vmax.f32 %v680_v22, %v1974_v41 }
 0x17d   : > { %v345_v25 = vpop.trf.xlu0 }
 0x17e   : > { %1320 = vmatmul.msk.f32.gmra.mxu2 %vm356_vm0, %v345_v25  ;;  %1352 = vmatmul.msk.f32.gmra.mxu3 %vm356_vm0, %v345_v25 }
 0x183   : > { %v1982_v44 = vpop.f32.mrf.mxu0  ;;  %v1996_v51 = vpop.f32.mrf.mxu1 }
 0x184   : > { %2528 = vst [vmem:[#allocation19_spill] sm:$0xff] %v1982_v44 }
 0x185   : > { %v346_v27 = vpop.trf.xlu0 }
 0x186   : > { %1321 = vmatmul.msk.f32.gmra.mxu2 %vm356_vm0, %v346_v27  ;;  %1353 = vmatmul.msk.f32.gmra.mxu3 %vm356_vm0, %v346_v27 }
 0x18b   : > { %v1988_v47 = vpop.f32.mrf.mxu0  ;;  %v2000_v53 = vpop.f32.mrf.mxu1 }
 0x18c   : > { %2529 = vst [vmem:[#allocation20_spill] sm:$0xff] %v2000_v53 }
 0x18d   : > { %v347_v28 = vpop.trf.xlu0 }
 0x18e   : > { %1322 = vmatmul.msk.f32.gmra.mxu2 %vm356_vm0, %v347_v28  ;;  %1354 = vmatmul.msk.f32.gmra.mxu3 %vm356_vm0, %v347_v28 }
 0x193   : > { %v1994_v50 = vpop.f32.mrf.mxu0  ;;  %v2006_v56 = vpop.f32.mrf.mxu1 }
 0x194   : > { %2530 = vst [vmem:[#allocation21_spill] sm:$0xff] %v2006_v56 }
 0x195   : > { %v348_v30 = vpop.trf.xlu0 }
 0x196   : > { %1323 = vmatmul.msk.f32.gmra.mxu2 %vm356_vm0, %v348_v30  ;;  %1355 = vmatmul.msk.f32.gmra.mxu3 %vm356_vm0, %v348_v30 }
 0x19b   : > { %v1998_v52 = vpop.f32.mrf.mxu0  ;;  %v2014_v60 = vpop.f32.mrf.mxu1 }
 0x19c   : > { %2532 = vst [vmem:[#allocation23_spill] sm:$0xff] %v2014_v60 }
 0x19d   : > { %v349_v32 = vpop.trf.xlu0 }
 0x19e   : > { %1324 = vmatmul.msk.f32.gmra.mxu2 %vm356_vm0, %v349_v32  ;;  %1356 = vmatmul.msk.f32.gmra.mxu3 %vm356_vm0, %v349_v32  ;;  %v683_v32 = vmax.f32 %v681_v23, %v1982_v44 }
 0x1a3   : > { %v2002_v54 = vpop.f32.mrf.mxu0  ;;  %v2022_v0 = vpop.f32.mrf.mxu1 }
 0x1a5   : > { %v350_v35 = vpop.trf.xlu0 }
 0x1a6   : > { %1325 = vmatmul.msk.f32.gmra.mxu2 %vm356_vm0, %v350_v35  ;;  %1357 = vmatmul.msk.f32.gmra.mxu3 %vm356_vm0, %v350_v35  ;;  %v684_v35 = vmax.f32 %v682_v24, %v1988_v47 }
 0x1ab   : > { %v2008_v57 = vpop.f32.mrf.mxu0  ;;  %v2030_v4 = vpop.f32.mrf.mxu1 }
 0x1ac   : > { %2531 = vst [vmem:[#allocation22_spill] sm:$0xff] %v2008_v57 }
 0x1ad   : > { %v351_v38 = vpop.trf.xlu0  ;;  %2534 = vst [vmem:[#allocation25_spill] sm:$0xff] %v2030_v4 }
 0x1ae   : > { %1326 = vmatmul.msk.f32.gmra.mxu2 %vm356_vm0, %v351_v38  ;;  %1358 = vmatmul.msk.f32.gmra.mxu3 %vm356_vm0, %v351_v38  ;;  %v685_v38 = vmax.f32 %v683_v32, %v1994_v50 }
 0x1b3   : > { %v2016_v61 = vpop.f32.mrf.mxu0  ;;  %v2040_v9 = vpop.f32.mrf.mxu1 }
 0x1b4   : > { %2533 = vst [vmem:[#allocation24_spill] sm:$0xff] %v2016_v61 }
 0x1b5   : > { %v352_v39 = vpop.trf.xlu0  ;;  %2536 = vst [vmem:[#allocation27_spill] sm:$0xff] %v2040_v9 }
 0x1b6   : > { %1327 = vmatmul.msk.f32.gmra.mxu2 %vm356_vm0, %v352_v39  ;;  %1359 = vmatmul.msk.f32.gmra.mxu3 %vm356_vm0, %v352_v39  ;;  %v686_v39 = vmax.f32 %v684_v35, %v1998_v52 }
 0x1bb   : > { %v2024_v1 = vpop.f32.mrf.mxu0  ;;  %v2048_v13 = vpop.f32.mrf.mxu1 }
 0x1bd   : > { %v353_v42 = vpop.trf.xlu0 }
 0x1be   : > { %1328 = vmatmul.msk.f32.gmra.mxu2 %vm356_vm0, %v353_v42  ;;  %1360 = vmatmul.msk.f32.gmra.mxu3 %vm356_vm0, %v353_v42  ;;  %v687_v42 = vmax.f32 %v685_v38, %v2002_v54 }
 0x1c3   : > { %v2032_v5 = vpop.f32.mrf.mxu0  ;;  %v2056_v17 = vpop.f32.mrf.mxu1 }
 0x1c5   : > { %v354_v45 = vpop.trf.xlu0 }
 0x1c6   : > { %1329 = vmatmul.msk.f32.gmra.mxu2 %vm356_vm0, %v354_v45  ;;  %1361 = vmatmul.msk.f32.gmra.mxu3 %vm356_vm0, %v354_v45  ;;  %v688_v45 = vmax.f32 %v686_v39, %v2008_v57  ;;  %v716_v57 = vmax.f32 %v1960_v33, %v1972_v40 }
 0x1c8   : > { %v690_v21 = vmax.f32 %v688_v45, %v2024_v1  ;;  %v717_v45 = vmax.f32 %v1966_v36, %v1980_v43 }
 0x1cb   : > { %v2042_v10 = vpop.f32.mrf.mxu0  ;;  %v2070_v25 = vpop.f32.mrf.mxu1 }
 0x1cc   : > { %v692_v23 = vmax.f32 %v690_v21, %v2042_v10 }
 0x1cd   : > { %v355_v48 = vpop.trf.xlu0 }
 0x1ce   : > { %1330 = vmatmul.msk.f32.gmra.mxu2 %vm356_vm0, %v355_v48  ;;  %1362 = vmatmul.msk.f32.gmra.mxu3 %vm356_vm0, %v355_v48  ;;  %v689_v48 = vmax.f32 %v687_v42, %v2016_v61 }
 0x1d0   : > { %v691_v41 = vmax.f32 %v689_v48, %v2032_v5 }
 0x1d3   : > { %v2050_v14 = vpop.f32.mrf.mxu0  ;;  %v2090_v44 = vpop.f32.mrf.mxu1 }
 0x1d4   : > { %v693_v35 = vmax.f32 %v691_v41, %v2050_v14  ;;  %v719_v41 = vmax.f32 %v717_v45, %v1992_v49 }
 0x1db   : > { %v2058_v18 = vpop.f32.mrf.mxu0 }
 0x1dc   : > { %v694_v38 = vmax.f32 %v692_v23, %v2058_v18 }
 0x1e3   : > { %v2072_v27 = vpop.f32.mrf.mxu0 }
 0x1e4   : > { %v695_v39 = vmax.f32 %v693_v35, %v2072_v27 }
 0x1eb   : > { %v2092_v24 = vpop.f32.mrf.mxu0 }
 0x1ec   : > { %2538 = vst [vmem:[#allocation29_spill] sm:$0xff] %v2092_v24  ;;  %v696_v42 = vmax.f32 %v694_v38, %v2092_v24  ;;  %v718_v38 = vmax.f32 %v716_v57, %v1986_v46  ;;  %v721_v24 = vmax.f32 %v719_v41, %v2000_v53 }
 0x1ee   : > { %v720_v40 = vmax.f32 %v718_v38, %v1996_v51  ;;  %v723_v45 = vmax.f32 %v721_v24, %v2014_v60 }
 0x1f0   : > { %v722_v57 = vmax.f32 %v720_v40, %v2006_v56  ;;  %v725_v41 = vmax.f32 %v723_v45, %v2030_v4 }
 0x1f1   : > { %v2004_v55 = vpop.f32.mrf.mxu3 }
 0x1f2   : > { %v727_v38 = vmax.f32 %v725_v41, %v2048_v13 }
 0x1f4   : > { %v729_v40 = vmax.f32 %v727_v38, %v2070_v25 }
 0x1f9   : > { %v2010_v58 = vpop.f32.mrf.mxu2  ;;  %v2012_v59 = vpop.f32.mrf.mxu3 }
 0x1fa   : > { %v697_v48 = vmax.f32 %v695_v39, %v2010_v58 }
 0x201   : > { %v2018_v62 = vpop.f32.mrf.mxu2  ;;  %v2020_v63 = vpop.f32.mrf.mxu3 }
 0x202   : > { %v698_v21 = vmax.f32 %v696_v42, %v2018_v62  ;;  %v2115_v42 = vpop.f32.mrf.mxu1 }
 0x203   : > { %2539 = vst [vmem:[#allocation30_spill] sm:$0xff] %v2115_v42 }
 0x209   : > { %v2026_v2 = vpop.f32.mrf.mxu2  ;;  %v2028_v3 = vpop.f32.mrf.mxu3 }
 0x20a   : > { %v699_v23 = vmax.f32 %v697_v48, %v2026_v2  ;;  %v2137_v4 = vpop.f32.mrf.mxu1 }
 0x211   : > { %v2034_v6 = vpop.f32.mrf.mxu2  ;;  %v2036_v7 = vpop.f32.mrf.mxu3 }
 0x212   : > { %v700_v35 = vmax.f32 %v698_v21, %v2034_v6 }
 0x219   : > { %v2038_v8 = vpop.f32.mrf.mxu2  ;;  %v2044_v11 = vpop.f32.mrf.mxu3 }
 0x21a   : > { %2535 = vst [vmem:[#allocation26_spill] sm:$0xff] %v2038_v8  ;;  %v701_v43 = vmax.f32 %v699_v23, %v2038_v8  ;;  %v724_v8 = vmax.f32 %v722_v57, %v2022_v0 }
 0x21b   : > { %2537 = vst [vmem:[#allocation28_spill] sm:$0xff] %v2044_v11 }
 0x221   : > { %v2046_v12 = vpop.f32.mrf.mxu2  ;;  %v2052_v15 = vpop.f32.mrf.mxu3 }
 0x222   : > { %v702_v39 = vmax.f32 %v700_v35, %v2046_v12 }
 0x229   : > { %v2054_v16 = vpop.f32.mrf.mxu2  ;;  %v2060_v19 = vpop.f32.mrf.mxu3 }
 0x22a   : > { %v703_v48 = vmax.f32 %v701_v43, %v2054_v16 }
 0x231   : > { %v2062_v20 = vpop.f32.mrf.mxu2  ;;  %v2074_v28 = vpop.f32.mrf.mxu3 }
 0x232   : > { %v704_v21 = vmax.f32 %v702_v39, %v2062_v20  ;;  %v726_v39 = vmax.f32 %v724_v8, %v2040_v9 }
 0x234   : > { %v728_v45 = vmax.f32 %v726_v39, %v2056_v17 }
 0x236   : > { %v730_v57 = vmax.f32 %v728_v45, %v2090_v44 }
 0x239   : > { %v2076_v30 = vpop.f32.mrf.mxu2  ;;  %v2094_v32 = vpop.f32.mrf.mxu3 }
 0x23a   : > { %v705_v23 = vmax.f32 %v703_v48, %v2076_v30  ;;  %v731_v48 = vmax.f32 %v729_v40, %v2115_v42 }
 0x23c   : > { %v733_v41 = vmax.f32 %v731_v48, %v2004_v55 }
 0x23e   : > { %v735_v8 = vmax.f32 %v733_v41, %v2020_v63 }
 0x241   : > { %v2086_v22 = vpop.f32.mrf.mxu2  ;;  %v2117_v36 = vpop.f32.mrf.mxu3 }
 0x242   : > { %v706_v35 = vmax.f32 %v704_v21, %v2086_v22 }
 0x249   : > { %v2104_v61 = vpop.f32.mrf.mxu2  ;;  %v2139_v56 = vpop.f32.mrf.mxu3 }
 0x24a   : > { %v707_v24 = vmax.f32 %v705_v23, %v2104_v61 }
 0x251   : > { %v2127_v53 = vpop.f32.mrf.mxu2 }
 0x252   : > { %v708_v43 = vmax.f32 %v706_v35, %v2127_v53  ;;  %v732_v35 = vmax.f32 %v730_v57, %v2137_v4 }
 0x254   : > { %v709_v60 = vmax.f32 %v707_v24, %v708_v43  ;;  %v734_v24 = vmax.f32 %v732_v35, %v2012_v59  ;;  %v737_v43 = vmax.f32 %v735_v8, %v2036_v7 }
 0x256   : > { %v710_v21 = vrot.slane %v709_v60, 4  ;;  %v736_v40 = vmax.f32 %v734_v24, %v2028_v3  ;;  %v739_v42 = vmax.f32 %v737_v43, %v2052_v15 }
 0x258   : > { %v711_v23 = vmax.f32 %v709_v60, %v710_v21  ;;  %v738_v45 = vmax.f32 %v736_v40, %v2044_v11  ;;  %v741_v48 = vmax.f32 %v739_v42, %v2074_v28  ;;  %v2151_v60 = vpop.f32.mrf.mxu3 }
 0x25a   : > { %v712_v38 = vrot.slane %v711_v23, 2  ;;  %v740_v21 = vmax.f32 %v738_v45, %v2060_v19  ;;  %v743_v57 = vmax.f32 %v741_v48, %v2117_v36 }
 0x25c   : > { %v713_v39 = vmax.f32 %v711_v23, %v712_v38  ;;  %v742_v35 = vmax.f32 %v740_v21, %v2094_v32  ;;  %v745_v23 = vmax.f32 %v743_v57, %v2151_v60 }
 0x25e   : > { %v714_v9 = vrot.slane %v713_v39, 1  ;;  %v744_v8 = vmax.f32 %v742_v35, %v2139_v56  ;;  %v2541_v35 = vld [vmem:[#allocation19_spill] sm:$0xff] }
 0x260   : > { %v2155_v41 = vmax.f32 %v713_v39, %v714_v9  ;;  %v746_v43 = vmax.f32 %v744_v8, %v745_v23 }
 0x262   : > { %v753_v38 = vsub.f32 %v1946_v26, %v2155_v41  ;;  %v755_v42 = vsub.f32 %v1950_v29, %v2155_v41  ;;  %v757_v24 = vsub.f32 %v1956_v31, %v2155_v41  ;;  %v759_v9 = vsub.f32 %v1962_v34, %v2155_v41  ;;  %v2540_v26 = vld [vmem:[#allocation17_spill] sm:$0xff] }
 0x263   : > { %v761_v45 = vsub.f32 %v1968_v37, %v2155_v41  ;;  %v747_v21 = vrot.slane %v746_v43, 4  ;;  %v763_v57 = vsub.f32 %v2540_v26, %v2155_v41  ;;  %v765_v31 = vsub.f32 %v2541_v35, %v2155_v41  ;;  %v2542_v35 = vld [vmem:[#allocation22_spill] sm:$0xff] }
 0x264   : > { %v817_v39 = vmul.f32 1.442695, %v753_v38  ;;  %v821_v40 = vmul.f32 1.442695, %v755_v42  ;;  %v825_v48 = vmul.f32 1.442695, %v757_v24  ;;  %v767_v34 = vsub.f32 %v1988_v47, %v2155_v41 }
 0x265   : > { %v829_v29 = vmul.f32 1.442695, %v759_v9  ;;  %v833_v23 = vmul.f32 1.442695, %v761_v45  ;;  %v748_v8 = vmax.f32 %v746_v43, %v747_v21  ;;  %v837_v38 = vmul.f32 1.442695, %v763_v57 }
 0x266   : > { %1447 = vpow2.f32 %v817_v39  ;;  %v769_v42 = vsub.f32 %v1994_v50, %v2155_v41  ;;  %v783_v9 = vsub.f32 %v2042_v10, %v2155_v41  ;;  %v841_v39 = vmul.f32 1.442695, %v765_v31 }
 0x267   : > { %1449 = vpow2.f32 %v821_v40  ;;  %v771_v43 = vsub.f32 %v1998_v52, %v2155_v41  ;;  %v749_v40 = vrot.slane %v748_v8, 2  ;;  %v845_v50 = vmul.f32 1.442695, %v767_v34 }
 0x268   : > { %1451 = vpow2.f32 %v825_v48  ;;  %v781_v48 = vsub.f32 %v2032_v5, %v2155_v41  ;;  %v773_v21 = vsub.f32 %v2002_v54, %v2155_v41  ;;  %v849_v10 = vmul.f32 1.442695, %v769_v42  ;;  %v2543_v54 = vld [vmem:[#allocation24_spill] sm:$0xff] }
 0x269   : > { %1453 = vpow2.f32 %v829_v29  ;;  %v779_v52 = vsub.f32 %v2024_v1, %v2155_v41  ;;  %v877_v29 = vmul.f32 1.442695, %v783_v9  ;;  %v775_v31 = vsub.f32 %v2542_v35, %v2155_v41 }
 0x26a   : > { %1455 = vpow2.f32 %v833_v23  ;;  %v853_v23 = vmul.f32 1.442695, %v771_v43  ;;  %v750_v34 = vmax.f32 %v748_v8, %v749_v40  ;;  %v777_v42 = vsub.f32 %v2543_v54, %v2155_v41 }
 0x26b   : > { %1457 = vpow2.f32 %v837_v38  ;;  %v785_v11 = vsub.f32 %v2050_v14, %v2155_v41  ;;  %v857_v1 = vmul.f32 1.442695, %v773_v21  ;;  %v787_v43 = vsub.f32 %v2058_v18, %v2155_v41  ;;  %v2544_v21 = vld [vmem:[#allocation29_spill] sm:$0xff] }
 0x26c   : > { %v2176_v37 = vpop.eup %1447  ;;  %1459 = vpow2.f32 %v841_v39  ;;  %v789_v8 = vsub.f32 %v2072_v27, %v2155_v41  ;;  %v869_v40 = vmul.f32 1.442695, %v779_v52  ;;  %v865_v35 = vmul.f32 1.442695, %v777_v42 }
 0x26d   : > { %v2180_v24 = vpop.eup %1449  ;;  %1461 = vpow2.f32 %v845_v50  ;;  %v861_v50 = vmul.f32 1.442695, %v775_v31  ;;  %v793_v18 = vsub.f32 %v2010_v58, %v2155_v41  ;;  %v797_v31 = vsub.f32 %v2026_v2, %v2155_v41 }
 0x26e   : > { %v945_v47 = vadd.f32 %v2180_v24, %v2176_v37  ;;  %v2188_v45 = vpop.eup %1451  ;;  %1463 = vpow2.f32 %v849_v10  ;;  %v791_v10 = vsub.f32 %v2544_v21, %v2155_v41  ;;  %v889_v42 = vmul.f32 1.442695, %v789_v8 }
 0x26f   : > { %v2195_v57 = vpop.eup %1453  ;;  %1465 = vpow2.f32 %v877_v29  ;;  %v795_v29 = vsub.f32 %v2018_v62, %v2155_v41  ;;  %v813_v2 = vsub.f32 %v2104_v61, %v2155_v41 }
 0x270   : > { %v946_v26 = vadd.f32 %v2188_v45, %v945_v47  ;;  %v2202_v38 = vpop.eup %1455  ;;  %v873_v47 = vmul.f32 1.442695, %v781_v48  ;;  %1467 = vpow2.f32 %v853_v23  ;;  %v885_v23 = vmul.f32 1.442695, %v787_v43 }
 0x271   : > { %v2209_v39 = vpop.eup %1457  ;;  %v893_v62 = vmul.f32 1.442695, %v791_v10  ;;  %v897_v43 = vmul.f32 1.442695, %v793_v18 }
 0x272   : > { %v947_v5 = vadd.f32 %v2195_v57, %v946_v26  ;;  %v751_v26 = vrot.slane %v750_v34, 1  ;;  %v2216_v14 = vpop.eup %1459  ;;  %1469 = vpow2.f32 %v873_v47 }
 0x273   : > { %1471 = vpow2.f32 %v857_v1  ;;  %v2223_v52 = vpop.eup %1461  ;;  %v799_v1 = vsub.f32 %v2034_v6, %v2155_v41 }
 0x274   : > { %v948_v9 = vadd.f32 %v2202_v38, %v947_v5  ;;  %v881_v5 = vmul.f32 1.442695, %v785_v11  ;;  %1473 = vpow2.f32 %v869_v40  ;;  %v2229_v54 = vpop.eup %1463  ;;  %v2232_v47 = vmax.f32 %v750_v34, %v751_v26 }
 0x275   : > { %1475 = vpow2.f32 %v861_v50  ;;  %v2234_v11 = vpop.eup %1465  ;;  %v815_v40 = vsub.f32 %v2127_v53, %v2155_v41  ;;  %v901_v50 = vmul.f32 1.442695, %v795_v29  ;;  %v909_v10 = vmul.f32 1.442695, %v799_v1 }
 0x276   : > { %v949_v48 = vadd.f32 %v2209_v39, %v948_v9  ;;  %1477 = vpow2.f32 %v865_v35  ;;  %v2238_v9 = vpop.eup %1467  ;;  %1019 = vmatpush.msrb.mxu2 %v2234_v11  ;;  %v754_v61 = vsub.f32 %v1960_v33, %v2232_v47  ;;  %v2545_v35 = vld [vmem:[#allocation15_spill] sm:$0xff]  ;;  %v811_v53 = vsub.f32 %v2086_v22, %v2155_v41  ;;  %v2546_v33 = vld [vmem:[#allocation16_spill] sm:$0xff] }
 0x277   : > { %1479 = vpow2.f32 %v881_v5  ;;  %v756_v18 = vsub.f32 %v2545_v35, %v2232_v47  ;;  %v809_v1 = vsub.f32 %v2076_v30, %v2155_v41 }
 0x278   : > { %v950_v27 = vadd.f32 %v2216_v14, %v949_v48  ;;  %v1470_v34 = vpop.eup %1469  ;;  %1481 = vpow2.f32 %v885_v23  ;;  %v905_v48 = vmul.f32 1.442695, %v797_v31  ;;  %v941_v23 = vmul.f32 1.442695, %v815_v40 }
 0x279   : > { %v1472_v6 = vpop.eup %1471  ;;  %1483 = vpow2.f32 %v889_v42  ;;  %1020 = vmatpush.msrb.mxu2 %v1470_v34  ;;  %v758_v42 = vsub.f32 %v2546_v33, %v2232_v47  ;;  %v933_v35 = vmul.f32 1.442695, %v811_v53 }
 0x27a   : > { %v951_v58 = vadd.f32 %v2223_v52, %v950_v27  ;;  %v1474_v21 = vpop.eup %1473  ;;  %1485 = vpow2.f32 %v893_v62  ;;  %v937_v27 = vmul.f32 1.442695, %v813_v2  ;;  %v2547_v2 = vld [vmem:[#allocation18_spill] sm:$0xff] }
 0x27b   : > { %v1476_v5 = vpop.eup %1475  ;;  %1487 = vpow2.f32 %v897_v43  ;;  %1021 = vmatpush.msrb.mxu2 %v1474_v21  ;;  %v760_v43 = vsub.f32 %v2547_v2, %v2232_v47 }
 0x27c   : > { %v952_v8 = vadd.f32 %v2229_v54, %v951_v58  ;;  %v1478_v31 = vpop.eup %1477  ;;  %1489 = vpow2.f32 %v901_v50  ;;  %v823_v50 = vmul.f32 1.442695, %v756_v18  ;;  %v805_v18 = vsub.f32 %v2054_v16, %v2155_v41 }
 0x27d   : > { %v2255_v58 = vpop.eup %1479  ;;  %1491 = vpow2.f32 %v905_v48  ;;  %1022 = vmatpush.msrb.mxu2 %v1478_v31  ;;  %v762_v48 = vsub.f32 %v1986_v46, %v2232_v47  ;;  %v831_v53 = vmul.f32 1.442695, %v760_v43  ;;  %v803_v46 = vsub.f32 %v2046_v12, %v2155_v41 }
 0x27e   : > { %v953_v26 = vadd.f32 %v2238_v9, %v952_v8  ;;  %v819_v8 = vmul.f32 1.442695, %v754_v61  ;;  %v2259_v22 = vpop.eup %1481  ;;  %1493 = vpow2.f32 %v909_v10  ;;  %v827_v61 = vmul.f32 1.442695, %v758_v42 }
 0x27f   : > { %v2263_v40 = vpop.eup %1483  ;;  %1495 = vpow2.f32 %v937_v27  ;;  %1023 = vmatpush.msrb.mxu2 %v1476_v5  ;;  %v835_v42 = vmul.f32 1.442695, %v762_v48 }
 0x280   : > { %v954_v29 = vadd.f32 %v1472_v6, %v953_v26  ;;  %v807_v26 = vsub.f32 %v2062_v20, %v2155_v41  ;;  %v2267_v30 = vpop.eup %1485  ;;  %1497 = vpow2.f32 %v941_v23 }
 0x281   : > { %v2271_v10 = vpop.eup %1487  ;;  %1499 = vpow2.f32 %v819_v8  ;;  %1024 = vmatpush.msrb.mxu2 %v1472_v6  ;;  %v2548_v6 = vld [vmem:[#allocation26_spill] sm:$0xff] }
 0x282   : > { %v955_v62 = vadd.f32 %v1476_v5, %v954_v29  ;;  %v929_v29 = vmul.f32 1.442695, %v809_v1  ;;  %v2275_v20 = vpop.eup %1489  ;;  %v764_v5 = vsub.f32 %v1992_v49, %v2232_v47  ;;  %1501 = vpow2.f32 %v823_v50 }
 0x283   : > { %v2279_v27 = vpop.eup %1491  ;;  %1503 = vpow2.f32 %v933_v35  ;;  %1025 = vmatpush.msrb.mxu2 %v2238_v9  ;;  %v766_v49 = vsub.f32 %v1996_v51, %v2232_v47  ;;  %v2549_v9 = vld [vmem:[#allocation20_spill] sm:$0xff]  ;;  %v917_v51 = vmul.f32 1.442695, %v803_v46 }
 0x284   : > { %v956_v33 = vadd.f32 %v1478_v31, %v955_v62  ;;  %v925_v31 = vmul.f32 1.442695, %v807_v26  ;;  %v2284_v16 = vpop.eup %1493  ;;  %1505 = vpow2.f32 %v827_v61  ;;  %v921_v62 = vmul.f32 1.442695, %v805_v18  ;;  %v2550_v26 = vld [vmem:[#allocation21_spill] sm:$0xff] }
 0x285   : > { %v2290_v1 = vpop.eup %1495  ;;  %1507 = vpow2.f32 %v929_v29  ;;  %1026 = vmatpush.msrb.mxu2 %v2229_v54  ;;  %v768_v8 = vsub.f32 %v2549_v9, %v2232_v47  ;;  %v770_v35 = vsub.f32 %v2550_v26, %v2232_v47  ;;  %v843_v48 = vmul.f32 1.442695, %v766_v49  ;;  %v2551_v29 = vld [vmem:[#allocation23_spill] sm:$0xff] }
 0x286   : > { %v957_v2 = vadd.f32 %v1474_v21, %v956_v33  ;;  %v801_v21 = vsub.f32 %v2548_v6, %v2155_v41  ;;  %1509 = vpow2.f32 %v831_v53  ;;  %v839_v41 = vmul.f32 1.442695, %v764_v5 }
 0x287   : > { %1511 = vpow2.f32 %v925_v31  ;;  %1027 = vmatpush.msrb.mxu2 %v2223_v52  ;;  %v784_v33 = vsub.f32 %v2070_v25, %v2232_v47  ;;  %v774_v25 = vsub.f32 %v2022_v0, %v2232_v47  ;;  %v782_v53 = vsub.f32 %v2056_v17, %v2232_v47  ;;  %v2552_v0 = vld [vmem:[#allocation25_spill] sm:$0xff] }
 0x288   : > { %v958_v23 = vadd.f32 %v1470_v34, %v957_v2  ;;  %v2294_v34 = vpop.eup %1497  ;;  %1513 = vpow2.f32 %v835_v42  ;;  %v772_v2 = vsub.f32 %v2551_v29, %v2232_v47  ;;  %v847_v46 = vmul.f32 1.442695, %v768_v8 }
 0x289   : > { %v2298_v43 = vpop.eup %1499  ;;  %1039 = vmatpush.msrb.mxu3 %v2294_v34  ;;  %1515 = vpow2.f32 %v921_v62  ;;  %1028 = vmatpush.msrb.mxu2 %v2216_v14  ;;  %v851_v6 = vmul.f32 1.442695, %v770_v35  ;;  %v776_v49 = vsub.f32 %v2552_v0, %v2232_v47  ;;  %v780_v17 = vsub.f32 %v2048_v13, %v2232_v47 }
 0x28a   : > { %v959_v12 = vadd.f32 %v2234_v11, %v958_v23  ;;  %v2305_v54 = vpop.eup %1501  ;;  %v913_v11 = vmul.f32 1.442695, %v801_v21  ;;  %1517 = vpow2.f32 %v839_v41  ;;  %v879_v42 = vmul.f32 1.442695, %v784_v33  ;;  %v2553_v41 = vld [vmem:[#allocation27_spill] sm:$0xff] }
 0x28b   : > { %v2309_v61 = vpop.eup %1503  ;;  %v982_v5 = vadd.f32 %v2305_v54, %v2298_v43  ;;  %1040 = vmatpush.msrb.mxu3 %v2290_v1  ;;  %1519 = vpow2.f32 %v917_v51  ;;  %1029 = vmatpush.msrb.mxu2 %v2209_v39  ;;  %v855_v9 = vmul.f32 1.442695, %v772_v2  ;;  %v778_v51 = vsub.f32 %v2553_v41, %v2232_v47  ;;  %v2554_v41 = vld [vmem:[#allocation30_spill] sm:$0xff] }
 0x28c   : > { %v960_v50 = vadd.f32 %v2255_v58, %v959_v12  ;;  %v2318_v52 = vpop.eup %1505  ;;  %1521 = vpow2.f32 %v843_v48  ;;  %v875_v13 = vmul.f32 1.442695, %v782_v53  ;;  %v859_v35 = vmul.f32 1.442695, %v774_v25 }
 0x28d   : > { %v2324_v31 = vpop.eup %1507  ;;  %v983_v21 = vadd.f32 %v2318_v52, %v982_v5  ;;  %1041 = vmatpush.msrb.mxu3 %v2309_v61  ;;  %1523 = vpow2.f32 %v913_v11  ;;  %1030 = vmatpush.msrb.mxu2 %v2202_v38  ;;  %v871_v38 = vmul.f32 1.442695, %v780_v17  ;;  %v863_v29 = vmul.f32 1.442695, %v776_v49 }
 0x28e   : > { %v961_v18 = vadd.f32 %v2259_v22, %v960_v50  ;;  %v2330_v14 = vpop.eup %1509  ;;  %1525 = vpow2.f32 %v847_v46  ;;  %v867_v25 = vmul.f32 1.442695, %v778_v51  ;;  %v788_v51 = vsub.f32 %v2554_v41, %v2232_v47 }
 0x28f   : > { %v2336_v62 = vpop.eup %1511  ;;  %v984_v8 = vadd.f32 %v2330_v14, %v983_v21  ;;  %1042 = vmatpush.msrb.mxu3 %v2324_v31  ;;  %1527 = vpow2.f32 %v851_v6  ;;  %1031 = vmatpush.msrb.mxu2 %v2195_v57 }
 0x290   : > { %v962_v23 = vadd.f32 %v2263_v40, %v961_v18  ;;  %v2342_v39 = vpop.eup %1513  ;;  %1529 = vpow2.f32 %v879_v42 }
 0x291   : > { %v1516_v50 = vpop.eup %1515  ;;  %v985_v11 = vadd.f32 %v2342_v39, %v984_v8  ;;  %1043 = vmatpush.msrb.mxu3 %v2336_v62  ;;  %1531 = vpow2.f32 %v855_v9  ;;  %1032 = vmatpush.msrb.mxu2 %v2188_v45  ;;  %v816_v9 = vsub.f32 %v2151_v60, %v2232_v47 }
 0x292   : > { %v963_v12 = vadd.f32 %v2267_v30, %v962_v23  ;;  %v2350_v33 = vpop.eup %1517  ;;  %1533 = vpow2.f32 %v875_v13 }
 0x293   : > { %v1520_v48 = vpop.eup %1519  ;;  %v986_v2 = vadd.f32 %v2350_v33, %v985_v11  ;;  %1044 = vmatpush.msrb.mxu3 %v1516_v50  ;;  %1535 = vpow2.f32 %v859_v35  ;;  %1033 = vmatpush.msrb.mxu2 %v2180_v24  ;;  %v786_v24 = vsub.f32 %v2090_v44, %v2232_v47  ;;  %v790_v11 = vsub.f32 %v2137_v4, %v2232_v47 }
 0x294   : > { %v964_v26 = vadd.f32 %v2271_v10, %v963_v12  ;;  %v2355_v5 = vpop.eup %1521  ;;  %1537 = vpow2.f32 %v871_v38  ;;  %v794_v4 = vsub.f32 %v2012_v59, %v2232_v47 }
 0x295   : > { %v1524_v53 = vpop.eup %1523  ;;  %v987_v46 = vadd.f32 %v2355_v5, %v986_v2  ;;  %1045 = vmatpush.msrb.mxu3 %v1520_v48  ;;  %1539 = vpow2.f32 %v863_v29  ;;  %1034 = vmatpush.msrb.mxu2 %v2176_v37  ;;  %v883_v38 = vmul.f32 1.442695, %v786_v24  ;;  %v887_v2 = vmul.f32 1.442695, %v788_v51 }
 0x296   : > { %v965_v18 = vadd.f32 %v2275_v20, %v964_v26  ;;  %v2360_v23 = vpop.eup %1525  ;;  %1541 = vpow2.f32 %v867_v25  ;;  %v814_v26 = vsub.f32 %v2139_v56, %v2232_v47  ;;  %v792_v56 = vsub.f32 %v2004_v55, %v2232_v47 }
 0x297   : > { %v2362_v6 = vpop.eup %1527  ;;  %v988_v21 = vadd.f32 %v2360_v23, %v987_v46  ;;  %1046 = vmatpush.msrb.mxu3 %v1524_v53  ;;  %1543 = vpow2.f32 %v883_v38  ;;  %v796_v55 = vsub.f32 %v2020_v63, %v2232_v47 }
 0x298   : > { %v966_v57 = vadd.f32 %v2279_v27, %v965_v18  ;;  %v2367_v0 = vpop.eup %1529  ;;  %v812_v18 = vsub.f32 %v2117_v36, %v2232_v47  ;;  %v939_v25 = vmul.f32 1.442695, %v814_v26 }
 0x299   : > { %v1532_v49 = vpop.eup %1531  ;;  %v989_v42 = vadd.f32 %v2362_v6, %v988_v21  ;;  %1047 = vmatpush.msrb.mxu3 %v2284_v16  ;;  %1059 = vmatpush.msra.mxu2 %v2367_v0 }
 0x29a   : > { %v967_v45 = vadd.f32 %v2284_v16, %v966_v57  ;;  %v1534_v12 = vpop.eup %1533  ;;  %v935_v57 = vmul.f32 1.442695, %v812_v18 }
 0x29b   : > { %v1536_v8 = vpop.eup %1535  ;;  %v990_v13 = vadd.f32 %v1532_v49, %v989_v42  ;;  %1048 = vmatpush.msrb.mxu3 %v2279_v27  ;;  %1060 = vmatpush.msra.mxu2 %v1534_v12  ;;  %v943_v27 = vmul.f32 1.442695, %v816_v9 }
 0x29c   : > { %v968_v17 = vadd.f32 %v1524_v53, %v967_v45  ;;  %v1538_v44 = vpop.eup %1537  ;;  %v891_v53 = vmul.f32 1.442695, %v790_v11 }
 0x29d   : > { %v1540_v16 = vpop.eup %1539  ;;  %v991_v60 = vadd.f32 %v1536_v8, %v990_v13  ;;  %1049 = vmatpush.msrb.mxu3 %v2275_v20  ;;  %1061 = vmatpush.msra.mxu2 %v1538_v44  ;;  %v810_v20 = vsub.f32 %v2094_v32, %v2232_v47  ;;  %1545 = vpow2.f32 %v943_v27  ;;  %v895_v32 = vmul.f32 1.442695, %v792_v56 }
 0x29e   : > { %v969_v37 = vadd.f32 %v1520_v48, %v968_v17  ;;  %v1542_v48 = vpop.eup %1541  ;;  %1547 = vpow2.f32 %v887_v2  ;;  %v903_v17 = vmul.f32 1.442695, %v796_v55 }
 0x29f   : > { %1050 = vmatpush.msrb.mxu3 %v2271_v10  ;;  %1062 = vmatpush.msra.mxu2 %v1542_v48  ;;  %v808_v10 = vsub.f32 %v2074_v28, %v2232_v47  ;;  %v931_v63 = vmul.f32 1.442695, %v810_v20  ;;  %1549 = vpow2.f32 %v939_v25 }
 0x2a0   : > { %v970_v35 = vadd.f32 %v1516_v50, %v969_v37  ;;  %v992_v50 = vadd.f32 %v1540_v16, %v991_v60  ;;  %1551 = vpow2.f32 %v891_v53 }
 0x2a1   : > { %1051 = vmatpush.msrb.mxu3 %v2267_v30  ;;  %1063 = vmatpush.msra.mxu2 %v1540_v16  ;;  %v798_v30 = vsub.f32 %v2028_v3, %v2232_v47  ;;  %v804_v3 = vsub.f32 %v2052_v15, %v2232_v47  ;;  %v927_v21 = vmul.f32 1.442695, %v808_v10  ;;  %1553 = vpow2.f32 %v935_v57 }
 0x2a2   : > { %v971_v29 = vadd.f32 %v2336_v62, %v970_v35  ;;  %v993_v62 = vadd.f32 %v1542_v48, %v992_v50  ;;  %1555 = vpow2.f32 %v895_v32 }
 0x2a3   : > { %1052 = vmatpush.msrb.mxu3 %v2263_v40  ;;  %1064 = vmatpush.msra.mxu2 %v1536_v8  ;;  %v800_v40 = vsub.f32 %v2036_v7, %v2232_v47  ;;  %v2423_v7 = vld [vmem:[%s230_s30 + $0x8] sm:$0xff]  ;;  %1557 = vpow2.f32 %v931_v63  ;;  %v919_v9 = vmul.f32 1.442695, %v804_v3 }
 0x2a4   : > { %v972_v36 = vadd.f32 %v2324_v31, %v971_v29  ;;  %v994_v46 = vadd.f32 %v1538_v44, %v993_v62  ;;  %v806_v31 = vsub.f32 %v2060_v19, %v2232_v47  ;;  %v2412_v19 = vpop.eup %1543 }
 0x2a5   : > { %1053 = vmatpush.msrb.mxu3 %v2259_v22  ;;  %1065 = vmatpush.msra.mxu2 %v1532_v49  ;;  %v288_v22 = vld [vmem:[%s230_s30] sm:$0xff]  ;;  %v2426_v15 = vpop.eup %1545  ;;  %v2555_v49 = vld [vmem:[#allocation28_spill] sm:$0xff] }
 0x2a6   : > { %v973_v59 = vadd.f32 %v2309_v61, %v972_v36  ;;  %v899_v61 = vmul.f32 1.442695, %v794_v4  ;;  %v995_v45 = vadd.f32 %v1534_v12, %v994_v46  ;;  %v802_v42 = vsub.f32 %v2555_v49, %v2232_v47  ;;  %1035 = vmatmul.f32.vlgmr.msrb.gmra.mxu2 %v288_v22 }
 0x2a7   : > { %1054 = vmatpush.msrb.mxu3 %v2255_v58  ;;  %1066 = vmatpush.msra.mxu2 %v2362_v6  ;;  %v907_v58 = vmul.f32 1.442695, %v798_v30  ;;  %v911_v47 = vmul.f32 1.442695, %v800_v40 }
 0x2a8   : > { %v974_v28 = vadd.f32 %v2290_v1, %v973_v59  ;;  %v996_v24 = vadd.f32 %v2367_v0, %v995_v45  ;;  %1055 = vmatmul.f32.vlgmr.msrb.gmra.mxu3 %v2423_v7  ;;  %v2431_v0 = vpop.eup %1547  ;;  %1559 = vpow2.f32 %v899_v61  ;;  %v915_v51 = vmul.f32 1.442695, %v802_v42 }
 0x2a9   : > { %1079 = vmatpush.msra.mxu3 %v2426_v15  ;;  %1067 = vmatpush.msra.mxu2 %v2360_v23  ;;  %v1550_v6 = vpop.eup %1549  ;;  %1561 = vpow2.f32 %v927_v21 }
 0x2aa   : > { %v2415_v1 = vadd.f32 %v2294_v34, %v974_v28  ;;  %v923_v34 = vmul.f32 1.442695, %v806_v31  ;;  %v997_v12 = vadd.f32 %v2412_v19, %v996_v24  ;;  %v1552_v8 = vpop.eup %1551  ;;  %1563 = vpow2.f32 %v903_v17 }
 0x2ab   : > { %1080 = vmatpush.msra.mxu3 %v1550_v6  ;;  %1068 = vmatpush.msra.mxu2 %v2355_v5  ;;  %v1554_v41 = vpop.eup %1553 }
 0x2ac   : > { %v998_v37 = vadd.f32 %v2431_v0, %v997_v12  ;;  %1565 = vpow2.f32 %v923_v34  ;;  %v1556_v13 = vpop.eup %1555 }
 0x2ad   : > { %1567 = vpow2.f32 %v907_v58  ;;  %1081 = vmatpush.msra.mxu3 %v1554_v41  ;;  %1069 = vmatpush.msra.mxu2 %v2350_v33  ;;  %v1558_v23 = vpop.eup %1557 }
 0x2ae   : > { %v999_v44 = vadd.f32 %v1552_v8, %v998_v37  ;;  %1569 = vpow2.f32 %v919_v9  ;;  %v1560_v26 = vpop.eup %1559 }
 0x2af   : > { %1571 = vpow2.f32 %v911_v47  ;;  %1082 = vmatpush.msra.mxu3 %v1558_v23  ;;  %1070 = vmatpush.msra.mxu2 %v2342_v39  ;;  %v1562_v35 = vpop.eup %1561 }
 0x2b0   : > { %v1000_v16 = vadd.f32 %v1556_v13, %v999_v44  ;;  %1573 = vpow2.f32 %v915_v51  ;;  %v1564_v5 = vpop.eup %1563 }
 0x2b1   : > { %1083 = vmatpush.msra.mxu3 %v1562_v35  ;;  %1071 = vmatpush.msra.mxu2 %v2330_v14 }
 0x2b2   : > { %v1001_v11 = vadd.f32 %v1560_v26, %v1000_v16  ;;  %v1566_v38 = vpop.eup %1565 }
 0x2b3   : > { %v1568_v60 = vpop.eup %1567  ;;  %1084 = vmatpush.msra.mxu3 %v1566_v38  ;;  %1072 = vmatpush.msra.mxu2 %v2318_v52 }
 0x2b4   : > { %v1002_v48 = vadd.f32 %v1564_v5, %v1001_v11  ;;  %v1570_v33 = vpop.eup %1569 }
 0x2b5   : > { %v1572_v18 = vpop.eup %1571  ;;  %1085 = vmatpush.msra.mxu3 %v1570_v33  ;;  %1073 = vmatpush.msra.mxu2 %v2305_v54 }
 0x2b6   : > { %v1003_v27 = vadd.f32 %v1568_v60, %v1002_v48  ;;  %v1574_v39 = vpop.eup %1573 }
 0x2b7   : > { %1086 = vmatpush.msra.mxu3 %v1574_v39  ;;  %1074 = vmatpush.msra.mxu2 %v2298_v43  ;;  %v976_v43 = vrot.slane %v2415_v1, 4 }
 0x2b8   : > { %v1004_v29 = vadd.f32 %v1572_v18, %v1003_v27  ;;  %1075 = vmatmul.f32.vlgmr.msra.gmra.mxu2 %v288_v22 }
 0x2b9   : > { %1087 = vmatpush.msra.mxu3 %v1572_v18  ;;  %v977_v25 = vadd.f32 %v976_v43, %v2415_v1 }
 0x2ba   : > { %v1005_v56 = vadd.f32 %v1574_v39, %v1004_v29 }
 0x2bb   : > { %1088 = vmatpush.msra.mxu3 %v1568_v60  ;;  %v978_v36 = vrot.slane %v977_v25, 2 }
 0x2bc   : > { %v1006_v14 = vadd.f32 %v1570_v33, %v1005_v56 }
 0x2bd   : > { %1089 = vmatpush.msra.mxu3 %v1564_v5  ;;  %v979_v53 = vadd.f32 %v978_v36, %v977_v25 }
 0x2be   : > { %v1007_v2 = vadd.f32 %v1566_v38, %v1006_v14 }
 0x2bf   : > { %1090 = vmatpush.msra.mxu3 %v1560_v26  ;;  %v980_v62 = vrot.slane %v979_v53, 1 }
 0x2c0   : > { %v1008_v50 = vadd.f32 %v1562_v35, %v1007_v2 }
 0x2c1   : > { %1091 = vmatpush.msra.mxu3 %v1556_v13  ;;  %v981_v55 = vadd.f32 %v980_v62, %v979_v53 }
 0x2c2   : > { %v1009_v52 = vadd.f32 %v1558_v23, %v1008_v50  ;;  %v1580_v23 = vld [vmem:[%s1898_s29 + $0x8] sm:$0xff] }
 0x2c3   : > { %1092 = vmatpush.msra.mxu3 %v1552_v8  ;;  %1575 = vrcp.f32 %v981_v55  ;;  %v1110_v61 = vand.u32 2147483648, %v981_v55  ;;  %vm1104_vm2 = vweird.f32 %v981_v55  ;;  %v1108_v45 = vand.u32 2147483647, %v981_v55 }
 0x2c4   : > { %v1010_v4 = vadd.f32 %v1554_v41, %v1009_v52 }
 0x2c5   : > { %1093 = vmatpush.msra.mxu3 %v2431_v0  ;;  %v1111_v1 = vor.u32 1.1754944e-38, %v1110_v61  ;;  %vm1109_vm4 = vcmp.eq.f32.partialorder %v1108_v45, 8.507059e+37 }
 0x2c6   : > { %v1011_v20 = vadd.f32 %v1550_v6, %v1010_v4 }
 0x2c7   : > { %1094 = vmatpush.msra.mxu3 %v2412_v19 }
 0x2c8   : > { %v1012_v54 = vadd.f32 %v2426_v15, %v1011_v20  ;;  %1095 = vmatmul.f32.vlgmr.msra.gmra.mxu3 %v2423_v7  ;;  %v1579_v15 = vld [vmem:[%s1898_s29] sm:$0xff] }
 0x2c9   : > { %v1576_v10 = vpop.eup %1575 }
 0x2ca   : > { %v1013_v57 = vrot.slane %v1012_v54, 4  ;;  %v1100_v59 = vmul.f32 %v1576_v10, %v981_v55  ;;  %vm1105_vm1 = vweird.f32 %v1576_v10 }
 0x2cb   : > { %vm1106_vm3 = vmor %vm1104_vm2, %vm1105_vm1 }
 0x2cc   : > { %v1014_v32 = vadd.f32 %v1013_v57, %v1012_v54  ;;  %v1101_v46 = vsub.f32 1.0, %v1100_v59 }
 0x2ce   : > { %v1015_v30 = vrot.slane %v1014_v32, 2  ;;  %v1102_v31 = vmul.f32 %v1576_v10, %v1101_v46 }
 0x2d0   : > { %v1016_v63 = vadd.f32 %v1015_v30, %v1014_v32  ;;  %v1103_v28 = vadd.f32 %v1576_v10, %v1102_v31 }
 0x2d2   : > { %v1017_v40 = vrot.slane %v1016_v63, 1  ;;  %v1107_v3 = vsel %vm1106_vm3, %v1576_v10, %v1103_v28 }
 0x2d3   : > { %v1112_v22 = vsel %vm1109_vm4, %v1111_v1, %v1107_v3 }
 0x2d4   : > { %v1018_v24 = vadd.f32 %v1017_v40, %v1016_v63 }
 0x2d6   : > { %1577 = vrcp.f32 %v1018_v24  ;;  %v1125_v6 = vand.u32 2147483648, %v1018_v24  ;;  %vm1119_vm6 = vweird.f32 %v1018_v24  ;;  %v1123_v9 = vand.u32 2147483647, %v1018_v24 }
 0x2d8   : > { %v1126_v41 = vor.u32 1.1754944e-38, %v1125_v6  ;;  %vm1124_vm8 = vcmp.eq.f32.partialorder %v1123_v9, 8.507059e+37 }
 0x2dc   : > { %v1578_v42 = vpop.eup %1577 }
 0x2dd   : > { %v1115_v34 = vmul.f32 %v1578_v42, %v1018_v24  ;;  %vm1120_vm5 = vweird.f32 %v1578_v42 }
 0x2de   : > { %vm1121_vm7 = vmor %vm1119_vm6, %vm1120_vm5 }
 0x2df   : > { %v1116_v0 = vsub.f32 1.0, %v1115_v34 }
 0x2e1   : > { %v1117_v58 = vmul.f32 %v1578_v42, %v1116_v0 }
 0x2e3   : > { %v1118_v12 = vadd.f32 %v1578_v42, %v1117_v58 }
 0x2e5   : > { %v1122_v47 = vsel %vm1121_vm7, %v1578_v42, %v1118_v12 }
 0x2e6   : > { %v1127_v13 = vsel %vm1124_vm8, %v1126_v41, %v1122_v47 }
 0x329   : > { %v1036_v21 = vpop.f32.mrf.mxu2 }
 0x32b   : > { %v1056_v19 = vpop.f32.mrf.mxu3 }
 0x32c   : > { %v1057_v17 = vadd.f32 %v1056_v19, %v1036_v21 }
 0x32e   : > { %v1129_v7 = vmul.f32 %v1112_v22, %v1057_v17 }
 0x330   : > { %v1131_v49 = vadd.f32 %v1579_v15, %v1129_v7 }
 0x332   : > { %1133 = vst [vmem:[%s283_s18] sm:$0xff] %v1131_v49 }
 0x33b   : > { %v1076_v8 = vpop.f32.mrf.mxu2 }
 0x34b   : > { %v1096_v37 = vpop.f32.mrf.mxu3 }
 0x34c   : > { %v1097_v51 = vadd.f32 %v1096_v37, %v1076_v8 }
 0x34e   : > { %v1130_v44 = vmul.f32 %v1127_v13, %v1097_v51 }
 0x350   : > { %v1132_v26 = vadd.f32 %v1580_v23, %v1130_v44 }
 0x352   : > { %1134 = vst [vmem:[%s283_s18 + $0x8] sm:$0xff] %v1132_v26 }
 0x353   : > { %1698 = shalt.err (!%p1695_p13)
}
 0x354   : > { %1380 = dma.vmem_to_hbm [thread:$0]  (%p1834_p9), %s1152_s23, 256, %s1154_s6, %s1136_s15  }
 0x355 PF: > { %s1165_s22 = sand.u32 1, %s1737_s12   ;;  %p1393_p0 = pnand %p1284_p12, %p1841_p11 }
 0x356   : > { %s1166_s28 = scalar_lea.sflag [#allocation4], %s1165_s22 }
 0x357   : > { %p1394_p1 = pneg %p1393_p0 }
 0x359   : > { %1732 = dma.done.wait (%p1394_p1), %s1166_s28, 256  }
 0x35a   : > { %1734 = vsyncadd (%p1394_p1), %s1166_s28, 4294967040  ;;  %s22_s17 = sadd.s32 1, %s1757_s17   ;;  %s2556_s30 = sld [smem:[#allocation14_spill]] }
 0x35b   : > { %p19_p2 = scmp.ge.s32.totalorder %s22_s17, 4   ;;  %s2557_s15 = sld [smem:[#allocation12_spill]] }
 0x35c   : > { %s2558_s16 = sld [smem:[#allocation13_spill]]  ;;  %s2559_s12 = smov %s1741_s13 }
 0x35d   : > { %s2560_s13 = smov %s1745_s14  ;;  %21 = sbr.rel (!%p19_p2) target bundleno = 10 (0xa), region = 101 }
 0x360   : > { %s2561_s14 = smov %s2556_s30 }
 0x362   :  { %1172 = vsyncpa [#allocation3], 1 }
 0x363   :  { %1174 = vsyncpa [#allocation3 + $0x1], 1 }
 0x364   :  { %1175 = vsyncpa [#allocation6], 1 }
 0x365   :  { %1177 = vsyncpa [#allocation6 + $0x1], 1 }
 0x366   :  { %1178 = vsyncpa [#allocation4], 1 }
 0x367   :  { %1180 = vsyncpa [#allocation4 + $0x1], 1 }

</bundles_post_ra>
